<compile_context>
chip_gen: v7x
topology: tpu7x:2x2x1
jax: 0.10.0
libtpu: 0.0.40
codegen_flags: <defaults>
</compile_context>

<pallas_src>
import functools

import jax
import jax.numpy as jnp
from jax import lax
from jax.experimental import pallas as pl
from jax.experimental.pallas import tpu as pltpu

LN_EPS = 1e-5


def _largest_divisor_le(n, target, quantum):
    """Largest divisor of n that is a multiple of `quantum` and <= target.

    Requires n % quantum == 0 (so `quantum` always qualifies).  Never returns
    n unless n <= target -- this fixes the old fallback that could return the
    full dimension and blow the VMEM budget."""
    target = max(min(n, target), quantum)
    t = (target // quantum) * quantum
    while t > quantum:
        if n % t == 0:
            return t
        t -= quantum
    return quantum


def _choose_tiles(B, S, E, itemsize, budget_bytes):
    """Pick (TB, TS): batch tile first (small), then spend budget on sequence."""
    row_bytes = max(1, E * itemsize)

    # --- Batch tile first: small, multiple of 8, guaranteeing >= 2 batch
    # tiles whenever possible (v7x dual-TensorCore split via "parallel").
    if B % 8 == 0 and B >= 16:
        TB = 8
    else:
        TB = B  # full-B block (allowed by the (8,128) rule); single batch tile.

    # --- Sequence tile: spend the block budget on the reduction axis.
    max_s_rows = max(8, budget_bytes // (TB * row_bytes))
    if S <= max_s_rows:
        TS = S
    elif S % 8 == 0:
        TS = _largest_divisor_le(S, max_s_rows, 8)
    else:
        TS = S  # no usable multiple-of-8 divisor; full-S fallback (see TODO).

    # --- If the whole sequence fits with slack, grow TB (keeping >= 2 batch
    # tiles) so the ~0.35us per-grid-step overhead stays amortized.
    if TS == S and B % 8 == 0 and B >= 16:
        slack_rows = max(8, budget_bytes // max(1, S * row_bytes))
        tb_cap = max(8, ((B // 2) // 8) * 8)  # keep >= 2 batch tiles
        TB = max(TB, _largest_divisor_le(B, min(slack_rows, tb_cap), 8))

    return TB, TS


def _pick_seq_chunk(TS, itemsize):
    """How many sequence rows to widen to f32 at a time inside the kernel."""
    if itemsize >= 4 or TS <= 512:
        return TS
    chunk = max(512, -(-TS // 16))      # bound f32 temp, cap unroll at ~16
    chunk = ((chunk + 7) // 8) * 8
    return min(chunk, TS)


def _vmem_capacity_bytes():
    try:
        info = pltpu.get_tpu_info()
        return int(getattr(info, "vmem_capacity_bytes", 128 << 20))
    except Exception:
        return 128 << 20


def _cls_head_kernel(x_ref, w_ref, b_ref, o_ref, acc_ref, *, inv_s, seq_chunk):
    # x_ref:   (TB, TS, E)  native dtype (streamed)
    # w_ref:   (E, C_pad)   folded weight  gamma * W^T, zero-padded
    # b_ref:   (1, C_pad)   folded bias    beta @ W^T + b, zero-padded (f32)
    # o_ref:   (TB, C_pad)  output (x.dtype)
    # acc_ref: (TB, E)      f32 sequence-sum accumulator (VMEM scratch)
    sj = pl.program_id(1)

    @pl.when(sj == 0)
    def _init():
        acc_ref[...] = jnp.zeros_like(acc_ref)

    # Accumulate the sequence sum in f32, widening only `seq_chunk` rows at a
    # time (static slices of the ref) so sub-32-bit inputs never materialize
    # a full (TB, TS, E) f32 temp in VMEM.
    ts = x_ref.shape[1]
    for start in range(0, ts, seq_chunk):
        stop = min(start + seq_chunk, ts)
        acc_ref[...] += jnp.sum(x_ref[:, start:stop, :].astype(jnp.float32),
                                axis=1)

    @pl.when(sj == pl.num_programs(1) - 1)
    def _finalize():
        m = acc_ref[...] * inv_s                           # (TB, E) mean over S
        mu = jnp.mean(m, axis=-1, keepdims=True)           # (TB, 1)
        diff = m - mu
        var = jnp.mean(diff * diff, axis=-1, keepdims=True)
        xn = diff * lax.rsqrt(var + LN_EPS)                # EUP rsqrt
        out = jnp.dot(xn.astype(w_ref.dtype), w_ref[...],  # MXU, f32 accumulate
                      preferred_element_type=jnp.float32)
        o_ref[...] = (out + b_ref[...]).astype(o_ref.dtype)  # lane-dense store


def classification_head(x, gamma, beta, w, b, *, block_budget_bytes=None):
    """x: (B, S, E); gamma/beta: (E,); w: (C, E) torch layout; b: (C,) -> (B, C)."""
    B, S, E = x.shape
    C = w.shape[0]
    C_pad = ((C + 127) // 128) * 128                       # lane-dense output width

    itemsize = jnp.dtype(x.dtype).itemsize
    out_dtype = x.dtype
    w_dtype = jnp.float32 if x.dtype == jnp.float32 else jnp.bfloat16

    # --- Fold LayerNorm affine into the Linear (done once in the wrapper):
    #   (xn*gamma + beta) @ W^T + b == xn @ (gamma[:,None]*W^T) + (beta@W^T + b)
    gamma_f = gamma.astype(jnp.float32)
    beta_f = beta.astype(jnp.float32)
    w_f = w.astype(jnp.float32)                            # (C, E)
    b_f = b.astype(jnp.float32)
    w_eff = gamma_f[:, None] * w_f.T                       # (E, C)
    b_eff = beta_f @ w_f.T + b_f                           # (C,)
    w_pad = jnp.zeros((E, C_pad), w_dtype).at[:, :C].set(w_eff.astype(w_dtype))
    b_pad = jnp.zeros((1, C_pad), jnp.float32).at[:, :C].set(b_eff)

    # --- Generation-aware block budget & VMEM caps.
    vmem_phys = _vmem_capacity_bytes()
    is_small_vmem = vmem_phys <= (64 << 20)                # v7x-class
    if block_budget_bytes is None:
        block_budget_bytes = (8 << 20) if is_small_vmem else (12 << 20)
    vmem_cap = (46 << 20) if is_small_vmem else (100 << 20)
    fit_cap = (40 << 20) if is_small_vmem else (80 << 20)

    TB, TS = _choose_tiles(B, S, E, itemsize, block_budget_bytes)
    seq_chunk = _pick_seq_chunk(TS, itemsize)
    grid = (B // TB, S // TS)
    n_steps = grid[0] * grid[1]

    # --- VMEM accounting & buffer depth for the x stream.
    x_block_bytes = TB * TS * E * itemsize
    w_bytes = E * C_pad * jnp.dtype(w_dtype).itemsize
    b_bytes = C_pad * 4
    out_bytes = TB * C_pad * jnp.dtype(out_dtype).itemsize
    acc_bytes = TB * E * 4
    chunk_f32_bytes = TB * seq_chunk * E * 4 if itemsize < 4 else 0
    fixed_bytes = 2 * (w_bytes + b_bytes + out_bytes) + acc_bytes + chunk_f32_bytes

    x_bufs = 2
    if n_steps >= 3 and (3 * x_block_bytes + fixed_bytes) <= fit_cap:
        x_bufs = 3                                         # keep DMAs back-to-back

    needed = x_bufs * x_block_bytes + fixed_bytes
    vmem_limit = int(min(vmem_cap, max(needed + (4 << 20), 16 << 20)))

    x_spec_kwargs = {}
    if x_bufs != 2:
        x_spec_kwargs["pipeline_mode"] = pl.Buffered(x_bufs)
    x_spec = pl.BlockSpec((TB, TS, E), lambda i, s: (i, s, 0), **x_spec_kwargs)

    cost = pl.CostEstimate(
        flops=int(B * S * E + 8 * B * E + 2 * B * E * C_pad),
        transcendentals=int(B),
        bytes_accessed=int(B * S * E * itemsize + w_bytes + b_bytes
                           + B * C_pad * jnp.dtype(out_dtype).itemsize),
    )

    out_padded = pl.pallas_call(
        functools.partial(_cls_head_kernel, inv_s=1.0 / S, seq_chunk=seq_chunk),
        out_shape=jax.ShapeDtypeStruct((B, C_pad), out_dtype),
        grid_spec=pltpu.PrefetchScalarGridSpec(
            num_scalar_prefetch=0,
            grid=grid,
            in_specs=[
                x_spec,                                            # x (streamed)
                pl.BlockSpec((E, C_pad), lambda i, s: (0, 0)),     # folded W^T
                pl.BlockSpec((1, C_pad), lambda i, s: (0, 0)),     # folded bias
            ],
            out_specs=pl.BlockSpec((TB, C_pad), lambda i, s: (i, 0)),
            scratch_shapes=[pltpu.VMEM((TB, E), jnp.float32)],
        ),
        compiler_params=pltpu.CompilerParams(
            dimension_semantics=("parallel", "arbitrary"),
            vmem_limit_bytes=vmem_limit,
        ),
        cost_estimate=cost,
    )(x, w_pad, b_pad)

    return out_padded[:, :C]


def _reference(x, gamma, beta, w, b):
    m = jnp.mean(x.astype(jnp.float32), axis=1)
    mu = jnp.mean(m, axis=-1, keepdims=True)
    var = jnp.mean((m - mu) ** 2, axis=-1, keepdims=True)
    xn = (m - mu) / jnp.sqrt(var + LN_EPS)
    y = xn * gamma.astype(jnp.float32) + beta.astype(jnp.float32)
    return y @ w.T.astype(jnp.float32) + b.astype(jnp.float32)


if __name__ == "__main__":
    key = jax.random.PRNGKey(0)
    (kx, kw, kb, kg, kbe, kx2, kw2, kb2, kg2, kbe2) = jax.random.split(key, 10)

    # --- Test 1: module-spec small shapes, f32 (exact check, incl. LN fold). ---
    B, S, E, C = 2, 8, 32, 4
    x = jax.random.normal(kx, (B, S, E), dtype=jnp.float32)
    gamma = 1.0 + 0.1 * jax.random.normal(kg, (E,), dtype=jnp.float32)
    beta = 0.05 * jax.random.normal(kbe, (E,), dtype=jnp.float32)
    w = jax.random.normal(kw, (C, E), dtype=jnp.float32) * 0.02
    b = jax.random.normal(kb, (C,), dtype=jnp.float32) * 0.02

    out = jax.block_until_ready(classification_head(x, gamma, beta, w, b))
    ref = _reference(x, gamma, beta, w, b)
    assert out.shape == (B, C) and out.dtype == jnp.float32
    assert jnp.allclose(out, ref, atol=1e-5, rtol=1e-5), "f32 mismatch vs reference"

    # --- Test 2: bf16 native-dtype streaming on the same shapes. ---
    out_bf16 = jax.block_until_ready(
        classification_head(x.astype(jnp.bfloat16), gamma, beta, w, b))
    assert out_bf16.shape == (B, C) and out_bf16.dtype == jnp.bfloat16
    assert jnp.allclose(out_bf16.astype(jnp.float32), ref, atol=5e-2, rtol=5e-2), \
        "bf16 mismatch vs reference"

    # --- Test 3: multi-tile grid (batch x sequence tiles) with a forced-small
    # block budget, exercising TB-first tiling, the cross-tile accumulator,
    # and the Buffered(3) x stream. ---
    B2, S2, E2, C2 = 32, 256, 64, 5
    x2 = jax.random.normal(kx2, (B2, S2, E2), dtype=jnp.float32)
    gamma2 = 1.0 + 0.1 * jax.random.normal(kg2, (E2,), dtype=jnp.float32)
    beta2 = 0.05 * jax.random.normal(kbe2, (E2,), dtype=jnp.float32)
    w2 = jax.random.normal(kw2, (C2, E2), dtype=jnp.float32) * 0.02
    b2 = jax.random.normal(kb2, (C2,), dtype=jnp.float32) * 0.02

    out2 = jax.block_until_ready(
        classification_head(x2.astype(jnp.bfloat16), gamma2, beta2, w2, b2,
                            block_budget_bytes=64 * 1024))
    ref2 = _reference(x2, gamma2, beta2, w2, b2)
    assert out2.shape == (B2, C2)
    assert jnp.allclose(out2.astype(jnp.float32), ref2, atol=5e-2, rtol=5e-2), \
        "tiled bf16 mismatch vs reference"

    print("KERNEL_OK")
</pallas_src>

<mosaic_0001>
module attributes {stable_mosaic.version = 11 : i64} {
  func.func @_cls_head_kernel(%arg0: i32, %arg1: i32, %arg2: memref<2x8x32xf32, #tpu.memory_space<vmem>>, %arg3: memref<32x128xf32, #tpu.memory_space<vmem>>, %arg4: memref<1x128xf32, #tpu.memory_space<vmem>>, %arg5: memref<2x128xf32, #tpu.memory_space<vmem>>, %arg6: memref<2x32xf32, #tpu.memory_space<vmem>>) attributes {dimension_semantics = [#tpu.dimension_semantics<parallel>, #tpu.dimension_semantics<arbitrary>], iteration_bounds = array<i64: 1, 1>, scalar_prefetch = 0 : i64, scratch_operands = 1 : i64, tpu.core_type = #tpu.core_type<tc>, window_params = [{transform_indices = @transform_0, window_bounds = array<i64: 2, 8, 32>}, {pipeline_mode = #tpu.pipeline_mode<synchronous>, transform_indices = @transform_1, window_bounds = array<i64: 32, 128>}, {pipeline_mode = #tpu.pipeline_mode<synchronous>, transform_indices = @transform_2, window_bounds = array<i64: 1, 128>}, {transform_indices = @transform_3, window_bounds = array<i64: 2, 128>}]} {
    %c0_i32 = arith.constant 0 : i32
    %0 = arith.cmpi eq, %arg1, %c0_i32 : i32
    %1 = arith.extui %0 : i1 to i32
    %c0_i32_0 = arith.constant 0 : i32
    %2 = arith.cmpi ne, %1, %c0_i32_0 : i32
    scf.if %2 {
      %cst_9 = arith.constant 0.000000e+00 : f32
      %11 = vector.broadcast %cst_9 : f32 to vector<2x32xf32>
      %c0_10 = arith.constant 0 : index
      %c0_11 = arith.constant 0 : index
      %12 = vector.load %arg6[%c0_10, %c0_11] : memref<2x32xf32, #tpu.memory_space<vmem>>, vector<2x32xf32>
      tpu.vector_store %arg6[%c0_10, %c0_11], %11 {strides = array<i32>} : memref<2x32xf32, #tpu.memory_space<vmem>>, vector<2x32xf32>,
    } else {
    }
    %c0 = arith.constant 0 : index
    %c0_1 = arith.constant 0 : index
    %3 = vector.load %arg6[%c0, %c0_1] : memref<2x32xf32, #tpu.memory_space<vmem>>, vector<2x32xf32>
    %c0_2 = arith.constant 0 : index
    %c0_3 = arith.constant 0 : index
    %c0_4 = arith.constant 0 : index
    %4 = vector.load %arg2[%c0_2, %c0_3, %c0_4] : memref<2x8x32xf32, #tpu.memory_space<vmem>>, vector<2x8x32xf32>
    %cst = arith.constant dense<0.000000e+00> : vector<2x32xf32>
    %5 = vector.multi_reduction <add>, %4, %cst [1] : vector<2x8x32xf32> to vector<2x32xf32>
    %6 = arith.addf %3, %5 : vector<2x32xf32>
    %c0_5 = arith.constant 0 : index
    %c0_6 = arith.constant 0 : index
    %7 = vector.load %arg6[%c0_5, %c0_6] : memref<2x32xf32, #tpu.memory_space<vmem>>, vector<2x32xf32>
    tpu.vector_store %arg6[%c0_5, %c0_6], %6 {strides = array<i32>} : memref<2x32xf32, #tpu.memory_space<vmem>>, vector<2x32xf32>,
    %c0_i32_7 = arith.constant 0 : i32
    %8 = arith.cmpi eq, %arg1, %c0_i32_7 : i32
    %9 = arith.extui %8 : i1 to i32
    %c0_i32_8 = arith.constant 0 : i32
    %10 = arith.cmpi ne, %9, %c0_i32_8 : i32
    scf.if %10 {
      %c0_9 = arith.constant 0 : index
      %c0_10 = arith.constant 0 : index
      %11 = vector.load %arg6[%c0_9, %c0_10] : memref<2x32xf32, #tpu.memory_space<vmem>>, vector<2x32xf32>
      %cst_11 = arith.constant 1.250000e-01 : f32
      %12 = vector.broadcast %cst_11 : f32 to vector<2x32xf32>
      %13 = arith.mulf %11, %12 : vector<2x32xf32>
      %cst_12 = arith.constant dense<0.000000e+00> : vector<2xf32>
      %14 = vector.multi_reduction <add>, %13, %cst_12 [1] : vector<2x32xf32> to vector<2xf32>
      %15 = vector.shape_cast %14 : vector<2xf32> to vector<2x1xf32>
      %cst_13 = arith.constant 3.200000e+01 : f32
      %16 = vector.broadcast %cst_13 : f32 to vector<2x1xf32>
      %17 = arith.divf %15, %16 : vector<2x1xf32>
      %18 = vector.broadcast %17 : vector<2x1xf32> to vector<2x32xf32>
      %19 = arith.subf %13, %18 : vector<2x32xf32>
      %20 = arith.mulf %19, %19 : vector<2x32xf32>
      %cst_14 = arith.constant dense<0.000000e+00> : vector<2xf32>
      %21 = vector.multi_reduction <add>, %20, %cst_14 [1] : vector<2x32xf32> to vector<2xf32>
      %22 = vector.shape_cast %21 : vector<2xf32> to vector<2x1xf32>
      %cst_15 = arith.constant 3.200000e+01 : f32
      %23 = vector.broadcast %cst_15 : f32 to vector<2x1xf32>
      %24 = arith.divf %22, %23 : vector<2x1xf32>
      %cst_16 = arith.constant 9.99999974E-6 : f32
      %25 = vector.broadcast %cst_16 : f32 to vector<2x1xf32>
      %26 = arith.addf %24, %25 : vector<2x1xf32>
      %27 = math.rsqrt %26 : vector<2x1xf32>
      %28 = vector.broadcast %27 : vector<2x1xf32> to vector<2x32xf32>
      %29 = arith.mulf %19, %28 : vector<2x32xf32>
      %c0_17 = arith.constant 0 : index
      %c0_18 = arith.constant 0 : index
      %30 = vector.load %arg3[%c0_17, %c0_18] : memref<32x128xf32, #tpu.memory_space<vmem>>, vector<32x128xf32>
      %cst_19 = arith.constant dense<0.000000e+00> : vector<2x128xf32>
      %31 = tpu.matmul %29, %30, %cst_19 {dimension_numbers = #tpu.dot_dimension_numbers<[1], [0], [0], [1], [0, 0, 1, 1], [], []>} : vector<2x32xf32>, vector<32x128xf32>, vector<2x128xf32> -> vector<2x128xf32>
      %c0_20 = arith.constant 0 : index
      %c0_21 = arith.constant 0 : index
      %32 = vector.load %arg4[%c0_20, %c0_21] : memref<1x128xf32, #tpu.memory_space<vmem>>, vector<1x128xf32>
      %33 = vector.broadcast %32 : vector<1x128xf32> to vector<2x128xf32>
      %34 = arith.addf %31, %33 : vector<2x128xf32>
      %c0_22 = arith.constant 0 : index
      %c0_23 = arith.constant 0 : index
      %35 = vector.load %arg5[%c0_22, %c0_23] : memref<2x128xf32, #tpu.memory_space<vmem>>, vector<2x128xf32>
      tpu.vector_store %arg5[%c0_22, %c0_23], %34 {strides = array<i32>} : memref<2x128xf32, #tpu.memory_space<vmem>>, vector<2x128xf32>,
    } else {
    }
    return
  }
  func.func @transform_0(%arg0: i32, %arg1: i32) -> (i32, i32, i32) {
    %c0_i32 = arith.constant 0 : i32
    %c0_i32_0 = arith.constant 0 : i32
    return %arg0, %arg1, %c0_i32 : i32, i32, i32
  }
  func.func @transform_1(%arg0: i32, %arg1: i32) -> (i32, i32) {
    %c0_i32 = arith.constant 0 : i32
    %c0_i32_0 = arith.constant 0 : i32
    %c0_i32_1 = arith.constant 0 : i32
    return %c0_i32, %c0_i32_0 : i32, i32
  }
  func.func @transform_2(%arg0: i32, %arg1: i32) -> (i32, i32) {
    %c0_i32 = arith.constant 0 : i32
    %c0_i32_0 = arith.constant 0 : i32
    %c0_i32_1 = arith.constant 0 : i32
    return %c0_i32, %c0_i32_0 : i32, i32
  }
  func.func @transform_3(%arg0: i32, %arg1: i32) -> (i32, i32) {
    %c0_i32 = arith.constant 0 : i32
    %c0_i32_0 = arith.constant 0 : i32
    return %arg0, %c0_i32 : i32, i32
  }
}

</mosaic_0001>

<bundles_post_ra>
// kernel: tpu_custom_call.1
= control target key start
LH: loop header
LB: loop body
LE: loop exit
PB: predicated region body
PF: predicated region fallthrough
CT: control target
= control target key end

     0   :  { %8 = vsyncpa [#allocation4], 0  ;;  %s375_s0 = inlined_call_operand.hbm [shape: f32[2,8,32], index: 0, kind: input, shape index: {}]   ;;  %s376_s1 = inlined_call_operand.hbm [shape: f32[32,128], index: 1, kind: input, shape index: {}]   ;;  %s377_s2 = inlined_call_operand.vmem [shape: f32[1,128], index: 2, kind: input, shape index: {}]   ;;  %s378_s3 = inlined_call_operand.hbm [shape: f32[2,128], index: 3, kind: output, shape index: {}]  }
   0x1   :  { %9 = vsyncpa [#allocation7], 0 }
   0x2   :  { %10 = vsyncpa [#allocation5], 0  ;;  %s301_s12 = smov [#allocation3]   ;;  %s229_s16 = scalar_lea.hbm %s375_s0, 256 }
   0x3   :  { %s16_s13 = sshll.u32 %s301_s12, 4  ;;  %p230_p0 = scmp.ne.s32.totalorder %s375_s0, %s229_s16  ;;  %s17_s13 = int_to_ptr.vmem [resolvable:$true] %s16_s13 }
   0x4   :  { %p233_p1 = scmp.lt.u32.totalorder %s229_s16, %s375_s0 }
   0x6   :  { %p235_p2 = pnand %p233_p1, %p230_p0 }
   0x8   :  { %238 = shalt.err (!%p235_p2)
}
   0x9   :  { %s239_s21 = scalar_lea.vmem %s17_s13, 256  ;;  %p244_p4 = scmp.lt.s32.totalorder %s17_s13, %s17_s13 }
   0xa   :  { %p240_p3 = scmp.ne.s32.totalorder %s17_s13, %s239_s21  ;;  %p245_p5 = scmp.lt.s32.totalorder %s239_s21, %s239_s21 }
   0xc   :  { %p246_p6 = por %p245_p5, %p244_p4 }
   0xe   :  { %p247_p7 = pnand %p246_p6, %p240_p3 }
  0x10   :  { %250 = shalt.err (!%p247_p7)
}
  0x11   :  { %s302_s22 = smov 128   ;;  %s303_s23 = smov 8  }
  0x12   :  { %22 = dma.hbm_to_vmem [thread:$0]  %s375_s0, 256, %s17_s13, [#allocation4], %s302_s22, %s302_s22, %s303_s23  }
  0x13   :  { %s304_s26 = smov [#allocation6]   ;;  %s251_s30 = scalar_lea.hbm %s376_s1, 512 }
  0x14   :  { %s28_s27 = sshll.u32 %s304_s26, 4  ;;  %p252_p8 = scmp.ne.s32.totalorder %s376_s1, %s251_s30  ;;  %s29_s27 = int_to_ptr.vmem [resolvable:$true] %s28_s27 }
  0x15   :  { %p255_p9 = scmp.lt.u32.totalorder %s251_s30, %s376_s1 }
  0x17   :  { %p257_p10 = pnand %p255_p9, %p252_p8 }
  0x19   :  { %260 = shalt.err (!%p257_p10)
}
  0x1a   :  { %s261_s8 = scalar_lea.vmem %s29_s27, 512  ;;  %p266_p12 = scmp.lt.s32.totalorder %s29_s27, %s29_s27 }
  0x1b   :  { %p262_p11 = scmp.ne.s32.totalorder %s29_s27, %s261_s8  ;;  %p267_p13 = scmp.lt.s32.totalorder %s261_s8, %s261_s8 }
  0x1d   :  { %p268_p0 = por %p267_p13, %p266_p12 }
  0x1f   :  { %p269_p1 = pnand %p268_p0, %p262_p11 }
  0x21   :  { %272 = shalt.err (!%p269_p1)
}
  0x22   :  { %34 = dma.hbm_to_vmem [thread:$0]  %s376_s1, 512, %s29_s27, [#allocation7], %s302_s22, %s302_s22, %s303_s23  }
  0x23   :  { %295 = dma.done.wait [#allocation4], 256  }
  0x24   :  { %296 = vsyncadd [#allocation4], 4294967040 }
  0x25   :  { %297 = dma.done.wait [#allocation7], 512  }
  0x26   :  { %298 = vsyncadd [#allocation7], 4294966784  ;;  %vm47_vm0 = vcmask 254976   ;;  %v305_v0 = vmov 0.0   ;;  %vm52_vm1 = vcmask 261120   ;;  %v50_v1 = vld [vmem:[#allocation3] sm:$0xff] }
  0x27   :  { %48 = vst.msk [vmem:[#allocation2] sm:$0x3] %vm47_vm0, %v305_v0  ;;  %v51_v2 = vld [vmem:[#allocation3 + $0x8] sm:$0xff]  ;;  %v53_v3 = vsel %vm52_vm1, %v50_v1, 0.0  ;;  %vm69_vm2 = vcmask 1041409   ;;  %v94_v28 = vld [vmem:[#allocation6] sm:$0xff] }
  0x28   :  { %v60_v4 = vsel %vm52_vm1, %v51_v2, 0.0  ;;  %v54_v5 = vrot.slane %v53_v3, 4  ;;  %v95_v29 = vld [vmem:[#allocation6 + $0x8] sm:$0xff]  ;;  %v96_v30 = vld [vmem:[#allocation6 + $0x10] sm:$0xff]  ;;  %v306_v31 = vmov 0.0|0.0   ;;  %v97_v33 = vld [vmem:[#allocation6 + $0x18] sm:$0xff] }
  0x29   :  { %v61_v6 = vrot.slane %v60_v4, 4  ;;  %213 = vmatprep.subr.bf16.mxu0 %v306_v31  ;;  %v214_v32 = vpack.c.bf16 %v95_v29, %v94_v28  ;;  %vm307_vm3 = vmmov 0   ;;  %v217_v34 = vpack.c.bf16 %v97_v33, %v96_v30  ;;  %v195_v40 = vld [vmem:[%s377_s2] ss:$0 sm:$0xff]  ;;  %s308_s11 = smov [#allocation8]  }
  0x2a   :  { %v55_v7 = vadd.f32 %v54_v5, %v53_v3  ;;  %210 = vmatprep.mubr.msk.f32.mxu0 %vm307_vm3, %v305_v0  ;;  %s185_s12 = sshll.u32 %s308_s11, 4  ;;  %s186_s12 = int_to_ptr.vmem [resolvable:$true] %s185_s12 }
  0x2b   :  { %v62_v8 = vadd.f32 %v61_v6, %v60_v4  ;;  %215 = vmatpush3.bf16.msra.mxu0 %v214_v32  ;;  %s273_s13 = scalar_lea.vmem %s186_s12, 32  ;;  %p278_p3 = scmp.lt.s32.totalorder %s186_s12, %s186_s12 }
  0x2c   :  { %v56_v9 = vrot.slane %v55_v7, 2  ;;  %216 = vmatprep.subr.bf16.mxu0 %v306_v31  ;;  %p274_p2 = scmp.ne.s32.totalorder %s186_s12, %s273_s13  ;;  %p279_p4 = scmp.lt.s32.totalorder %s273_s13, %s273_s13 }
  0x2d   :  { %v63_v10 = vrot.slane %v62_v8, 2 }
  0x2e   :  { %v57_v11 = vadd.f32 %v56_v9, %v55_v7  ;;  %v49_v15 = vld [vmem:[#allocation2] sm:$0x3]  ;;  %p280_p5 = por %p279_p4, %p278_p3 }
  0x2f   :  { %v64_v12 = vadd.f32 %v63_v10, %v62_v8  ;;  %218 = vmatpush3.bf16.msra.mxu0 %v217_v34 }
  0x30   :  { %v58_v13 = vrot.slane %v57_v11, 1  ;;  %p281_p6 = pnand %p280_p5, %p274_p2 }
  0x31   :  { %v65_v14 = vrot.slane %v64_v12, 1 }
  0x32   :  { %v59_v16 = vadd.f32 %v58_v13, %v57_v11 }
  0x33   :  { %v66_v17 = vadd.f32 %v65_v14, %v64_v12 }
  0x35   :  { %v70_v18 = vsel %vm69_vm2, %v66_v17, %v59_v16 }
  0x36   :  { %v72_v19 = vadd.f32 %v70_v18, %v49_v15 }
  0x38   :  { %74 = vst.msk [vmem:[#allocation2] sm:$0x3] %vm47_vm0, %v72_v19 }
  0x3f   :  { %v78_v20 = vld [vmem:[#allocation2] sm:$0x3] }
  0x40   :  { %v79_v21 = vmul.f32 0.125, %v78_v20 }
  0x42   :  { %v80_v22 = vsel %vm47_vm0, %v79_v21, 0.0 }
  0x43   :  { %81 = vadd.xlane.f32.xlu0 %v80_v22 }
  0xd0   :  { %v82_v23 = vpop.xlane.xlu0 %81 }
  0xd1   :  { %v84_v24 = vmul.f32 0.03125, %v82_v23 }
  0xd3   :  { %v85_v25 = vsub.f32 %v79_v21, %v84_v24 }
  0xd5   :  { %v86_v26 = vmul.f32 %v85_v25, %v85_v25 }
  0xd7   :  { %v87_v27 = vsel %vm47_vm0, %v86_v26, 0.0 }
  0xd8   :  { %88 = vadd.xlane.f32.xlu0 %v87_v27 }
 0x165   :  { %v89_v35 = vpop.xlane.xlu0 %88 }
 0x166   :  { %v90_v36 = vmul.f32 0.03125, %v89_v35 }
 0x168   :  { %v91_v37 = vadd.f32 1e-05, %v90_v36 }
 0x16a   :  { %227 = vrsqrt.f32 %v91_v37 }
 0x174   :  { %v228_v38 = vpop.eup %227 }
 0x175   :  { %v93_v39 = vmul.f32 %v228_v38, %v85_v25 }
 0x177   :  { %211 = vmatmul.mubr.msk.f32.vlgmr.msra.gmra.mrb[0].mxu0 %vm52_vm1, %v93_v39 }
 0x24a   :  { %v174_v41 = vpop.f32.mrb[0].mxu0 }
 0x24b   :  { %v175_v42 = vadd.f32 %v195_v40, %v174_v41  ;;  %v212_v43 = vpop.f32.mrb[1].mxu0 }
 0x24d   :  { %178 = vst [vmem:[#allocation8] sm:$0x3] %v175_v42 }
 0x24e   :  { %284 = shalt.err (!%p281_p6)
}
 0x24f   :  { %s285_s16 = scalar_lea.hbm %s378_s3, 32 }
 0x250   :  { %p286_p7 = scmp.ne.s32.totalorder %s378_s3, %s285_s16  ;;  %p289_p8 = scmp.lt.u32.totalorder %s285_s16, %s378_s3 }
 0x252   :  { %p291_p9 = pnand %p289_p8, %p286_p7 }
 0x254   :  { %294 = shalt.err (!%p291_p9)
}
 0x255   :  { %188 = dma.vmem_to_hbm [thread:$0]  %s186_s12, 32, %s378_s3, [#allocation5]  }
 0x256   :  { %299 = dma.done.wait [#allocation5], 32  }
 0x257   :  { %300 = vsyncadd [#allocation5], 4294967264 }
 0x258   :  { %192 = vsyncpa [#allocation4], 1 }
 0x259   :  { %193 = vsyncpa [#allocation7], 1 }
 0x25a   :  { %194 = vsyncpa [#allocation5], 1 }

</bundles_post_ra>
